<compile_context>
chip_gen: v7x
topology: tpu7x:2x2x1
jax: 0.10.0
libtpu: 0.0.40
codegen_flags: <defaults>
</compile_context>

<pallas_src>
import functools

import jax
import jax.numpy as jnp
from jax import lax
from jax.experimental import pallas as pl
from jax.experimental.pallas import tpu as pltpu

_LANE = 128
_SUBLANE = 8
# (2048, 128) f32 block = 1 MiB per input per pipeline buffer.
_DEFAULT_TILE_ROWS = 2048
# Leading "parallel" grid axis (v7x megacore); serial no-op on v5e/v6e.
_NUM_SLICES = 2


def _abs_diff_partial_kernel(a_ref, b_ref, out_ref, acc_ref, *,
                             total_rows, tile_rows, blocks_per_slice):
    s = pl.program_id(0)          # parallel slice (megacore sharding)
    i = pl.program_id(1)          # reduction step within the slice

    @pl.when(i == 0)
    def _():
        acc_ref[...] = jnp.zeros_like(acc_ref)

    diff = a_ref[...].astype(jnp.float32) - b_ref[...].astype(jnp.float32)
    absdiff = jnp.abs(diff)

    # Mask rows past the logical end (partial last block / overflow blocks whose
    # index_map was clamped). Interior blocks see an all-true mask: one cheap
    # VPU select per element, well under the DMA bound.
    row_base = (s * blocks_per_slice + i) * tile_rows
    row_ids = row_base + lax.broadcasted_iota(jnp.int32, absdiff.shape, 0)
    absdiff = jnp.where(row_ids < total_rows, absdiff, 0.0)

    # VPU-only partial reduction: fold groups of 8 sublanes into the (8, 128)
    # accumulator. No per-step cross-lane traffic.
    acc_ref[...] += jnp.sum(absdiff.reshape(-1, _SUBLANE, _LANE), axis=0)

    @pl.when(i == pl.num_programs(1) - 1)
    def _():
        out_ref[...] = acc_ref[...].reshape(1, _SUBLANE, _LANE)


def _abs_diff_sum(a: jax.Array, b: jax.Array, *,
                  tile_rows: int = _DEFAULT_TILE_ROWS) -> jax.Array:
    """sum(|a - b|) as an f32 scalar; the bulk is computed in a Pallas kernel."""
    assert a.shape == b.shape, (a.shape, b.shape)
    n = a.size
    a_flat = a.reshape(-1)
    b_flat = b.reshape(-1)

    total = jnp.float32(0.0)
    n_main = (n // _LANE) * _LANE

    if n_main:
        a2 = (a_flat if n_main == n else a_flat[:n_main]).reshape(-1, _LANE)
        b2 = (b_flat if n_main == n else b_flat[:n_main]).reshape(-1, _LANE)
        rows = n_main // _LANE

        # Tunable block height: multiple of the sublane count, no larger than
        # needed for small inputs.
        rows_rounded = ((rows + _SUBLANE - 1) // _SUBLANE) * _SUBLANE
        tr = max(_SUBLANE, min(int(tile_rows), rows_rounded))
        num_blocks = -(-rows // tr)
        num_slices = _NUM_SLICES if num_blocks >= _NUM_SLICES else 1
        blocks_per_slice = -(-num_blocks // num_slices)

        def in_map(s, i):
            # Clamp so overflow programs (when the slice split is uneven)
            # re-read the last real block; their rows are masked to zero.
            return (jnp.minimum(s * blocks_per_slice + i, num_blocks - 1), 0)

        kernel = functools.partial(
            _abs_diff_partial_kernel,
            total_rows=rows, tile_rows=tr, blocks_per_slice=blocks_per_slice)

        partials = pl.pallas_call(
            kernel,
            out_shape=jax.ShapeDtypeStruct((num_slices, _SUBLANE, _LANE),
                                           jnp.float32),
            grid_spec=pltpu.PrefetchScalarGridSpec(
                num_scalar_prefetch=0,
                grid=(num_slices, blocks_per_slice),
                in_specs=[
                    pl.BlockSpec((tr, _LANE), in_map),
                    pl.BlockSpec((tr, _LANE), in_map),
                ],
                out_specs=pl.BlockSpec((1, _SUBLANE, _LANE),
                                       lambda s, i: (s, 0, 0)),
                scratch_shapes=[pltpu.VMEM((_SUBLANE, _LANE), jnp.float32)],
            ),
            compiler_params=pltpu.CompilerParams(
                dimension_semantics=("parallel", "arbitrary"),
            ),
            cost_estimate=pl.CostEstimate(
                flops=3 * n_main,
                transcendentals=0,
                bytes_accessed=2 * n_main * a.dtype.itemsize
                               + num_slices * _SUBLANE * _LANE * 4,
            ),
        )(a2, b2)
        total = total + jnp.sum(partials)

    if n_main != n:
        # Ragged (<128-element) tail: negligible work, do it in plain JAX rather
        # than paying a full pad/copy pass over both inputs.
        a_tail = a_flat[n_main:].astype(jnp.float32)
        b_tail = b_flat[n_main:].astype(jnp.float32)
        total = total + jnp.sum(jnp.abs(a_tail - b_tail))

    return total


def l1_norm(prediction: jax.Array, target: jax.Array) -> jax.Array:
    """torch.sum(torch.abs(pred - target)) / torch.numel(pred)"""
    return _abs_diff_sum(prediction, target) / jnp.float32(prediction.size)


class CriterionSimple:
    """Simple weighted L1 loss (JAX/Pallas port of the PyTorch module)."""

    def __init__(self, wavelet_weigt: float, image_weights: float) -> None:
        self.name = "Simple"
        self.wavelet_weight = wavelet_weigt
        self.image_weight = image_weights

    def forward(self, pred, target, pred_wavelets, target_wavelets, inps=None):
        # TODO(synk): the two reductions could be fused into one pallas_call,
        # but doing so without an extra concat/copy pass was not worth it here.
        loss_image = l1_norm(pred, target)
        loss_wavelet = l1_norm(pred_wavelets, target_wavelets)
        loss = (jnp.float32(self.image_weight) * loss_image
                + jnp.float32(self.wavelet_weight) * loss_wavelet)
        return loss, {"image_l1": loss_image, "wavelet_l1": loss_wavelet}

    __call__ = forward


if __name__ == "__main__":
    key = jax.random.PRNGKey(0)
    k1, k2, k3, k4 = jax.random.split(key, 4)

    # Small NCHW shapes consistent with the forward pass.
    pred = jax.random.normal(k1, (2, 4, 16, 16), dtype=jnp.float32)
    target = jax.random.normal(k2, (2, 4, 16, 16), dtype=jnp.float32)
    # Wavelet coefficients: 4 sub-bands per channel at half resolution.
    pred_wavelets = jax.random.normal(k3, (2, 4, 4, 8, 8), dtype=jnp.float32)
    target_wavelets = jax.random.normal(k4, (2, 4, 4, 8, 8), dtype=jnp.float32)

    criterion = CriterionSimple(wavelet_weigt=0.5, image_weights=1.0)
    loss, logs = criterion(pred, target, pred_wavelets, target_wavelets, {})
    loss = jax.block_until_ready(loss)

    # Cross-check against plain-JAX reference.
    ref_img = jnp.mean(jnp.abs(pred - target))
    ref_wav = jnp.mean(jnp.abs(pred_wavelets - target_wavelets))
    ref_loss = 1.0 * ref_img + 0.5 * ref_wav
    assert jnp.allclose(loss, ref_loss, rtol=1e-5, atol=1e-6), (loss, ref_loss)
    assert jnp.allclose(logs["image_l1"], ref_img, rtol=1e-5, atol=1e-6)
    assert jnp.allclose(logs["wavelet_l1"], ref_wav, rtol=1e-5, atol=1e-6)

    # Extra checks: in-kernel row masking + ragged lane tail (1155 elements).
    xa = jax.random.normal(jax.random.PRNGKey(1), (3, 5, 7, 11), dtype=jnp.float32)
    xb = jax.random.normal(jax.random.PRNGKey(2), (3, 5, 7, 11), dtype=jnp.float32)
    got = jax.block_until_ready(_abs_diff_sum(xa, xb))
    want = jnp.sum(jnp.abs(xa - xb))
    assert jnp.allclose(got, want, rtol=1e-5, atol=1e-3), (got, want)

    # Multi-block + 2-slice parallel path with an uneven split (clamped block).
    ya = jax.random.normal(jax.random.PRNGKey(3), (80, 128), dtype=jnp.float32)
    yb = jax.random.normal(jax.random.PRNGKey(4), (80, 128), dtype=jnp.float32)
    got2 = jax.block_until_ready(_abs_diff_sum(ya, yb, tile_rows=32))
    want2 = jnp.sum(jnp.abs(ya - yb))
    assert jnp.allclose(got2, want2, rtol=1e-5, atol=1e-3), (got2, want2)

    print("KERNEL_OK")
</pallas_src>

<mosaic_0001>
module attributes {stable_mosaic.version = 11 : i64} {
  func.func @_abs_diff_partial_kernel(%arg0: i32, %arg1: i32, %arg2: memref<16x128xf32, #tpu.memory_space<vmem>>, %arg3: memref<16x128xf32, #tpu.memory_space<vmem>>, %arg4: memref<1x8x128xf32, #tpu.memory_space<vmem>>, %arg5: memref<8x128xf32, #tpu.memory_space<vmem>>) attributes {dimension_semantics = [#tpu.dimension_semantics<parallel>, #tpu.dimension_semantics<arbitrary>], iteration_bounds = array<i64: 1, 1>, scalar_prefetch = 0 : i64, scratch_operands = 1 : i64, tpu.core_type = #tpu.core_type<tc>, window_params = [{transform_indices = @transform_0, window_bounds = array<i64: 16, 128>}, {transform_indices = @transform_1, window_bounds = array<i64: 16, 128>}, {transform_indices = @transform_2, window_bounds = array<i64: 1, 8, 128>}]} {
    %c0_i32 = arith.constant 0 : i32
    %0 = arith.cmpi eq, %arg1, %c0_i32 : i32
    %1 = arith.extui %0 : i1 to i32
    %c0_i32_0 = arith.constant 0 : i32
    %2 = arith.cmpi ne, %1, %c0_i32_0 : i32
    scf.if %2 {
      %cst_12 = arith.constant 0.000000e+00 : f32
      %25 = vector.broadcast %cst_12 : f32 to vector<8x128xf32>
      %c0_13 = arith.constant 0 : index
      %c0_14 = arith.constant 0 : index
      %26 = vector.load %arg5[%c0_13, %c0_14] : memref<8x128xf32, #tpu.memory_space<vmem>>, vector<8x128xf32>
      tpu.vector_store %arg5[%c0_13, %c0_14], %25 {strides = array<i32>} : memref<8x128xf32, #tpu.memory_space<vmem>>, vector<8x128xf32>,
    } else {
    }
    %c0 = arith.constant 0 : index
    %c0_1 = arith.constant 0 : index
    %3 = vector.load %arg2[%c0, %c0_1] : memref<16x128xf32, #tpu.memory_space<vmem>>, vector<16x128xf32>
    %c0_2 = arith.constant 0 : index
    %c0_3 = arith.constant 0 : index
    %4 = vector.load %arg3[%c0_2, %c0_3] : memref<16x128xf32, #tpu.memory_space<vmem>>, vector<16x128xf32>
    %5 = arith.subf %3, %4 : vector<16x128xf32>
    %6 = math.absf %5 : vector<16x128xf32>
    %c1_i32 = arith.constant 1 : i32
    %7 = arith.muli %arg0, %c1_i32 : i32
    %8 = arith.addi %7, %arg1 : i32
    %c16_i32 = arith.constant 16 : i32
    %9 = arith.muli %8, %c16_i32 : i32
    %10 = tpu.iota {dimensions = array<i32: 0>} : vector<16x128xi32>
    %11 = vector.broadcast %9 : i32 to vector<16x128xi32>
    %12 = arith.addi %11, %10 : vector<16x128xi32>
    %c16_i32_4 = arith.constant 16 : i32
    %13 = vector.broadcast %c16_i32_4 : i32 to vector<16x128xi32>
    %14 = arith.cmpi slt, %12, %13 : vector<16x128xi32>
    %cst = arith.constant 0.000000e+00 : f32
    %15 = vector.broadcast %cst : f32 to vector<16x128xf32>
    %16 = arith.select %14, %6, %15 : vector<16x128xi1>, vector<16x128xf32>
    %c0_5 = arith.constant 0 : index
    %c0_6 = arith.constant 0 : index
    %17 = vector.load %arg5[%c0_5, %c0_6] : memref<8x128xf32, #tpu.memory_space<vmem>>, vector<8x128xf32>
    %18 = vector.shape_cast %16 : vector<16x128xf32> to vector<2x8x128xf32>
    %cst_7 = arith.constant dense<0.000000e+00> : vector<8x128xf32>
    %19 = vector.multi_reduction <add>, %18, %cst_7 [0] : vector<2x8x128xf32> to vector<8x128xf32>
    %20 = arith.addf %17, %19 : vector<8x128xf32>
    %c0_8 = arith.constant 0 : index
    %c0_9 = arith.constant 0 : index
    %21 = vector.load %arg5[%c0_8, %c0_9] : memref<8x128xf32, #tpu.memory_space<vmem>>, vector<8x128xf32>
    tpu.vector_store %arg5[%c0_8, %c0_9], %20 {strides = array<i32>} : memref<8x128xf32, #tpu.memory_space<vmem>>, vector<8x128xf32>,
    %c0_i32_10 = arith.constant 0 : i32
    %22 = arith.cmpi eq, %arg1, %c0_i32_10 : i32
    %23 = arith.extui %22 : i1 to i32
    %c0_i32_11 = arith.constant 0 : i32
    %24 = arith.cmpi ne, %23, %c0_i32_11 : i32
    scf.if %24 {
      %c0_12 = arith.constant 0 : index
      %c0_13 = arith.constant 0 : index
      %25 = vector.load %arg5[%c0_12, %c0_13] : memref<8x128xf32, #tpu.memory_space<vmem>>, vector<8x128xf32>
      %26 = vector.shape_cast %25 : vector<8x128xf32> to vector<1x8x128xf32>
      %c0_14 = arith.constant 0 : index
      %c0_15 = arith.constant 0 : index
      %c0_16 = arith.constant 0 : index
      %27 = vector.load %arg4[%c0_14, %c0_15, %c0_16] : memref<1x8x128xf32, #tpu.memory_space<vmem>>, vector<1x8x128xf32>
      tpu.vector_store %arg4[%c0_14, %c0_15, %c0_16], %26 {strides = array<i32>} : memref<1x8x128xf32, #tpu.memory_space<vmem>>, vector<1x8x128xf32>,
    } else {
    }
    return
  }
  func.func @transform_0(%arg0: i32, %arg1: i32) -> (i32, i32) {
    %c1_i32 = arith.constant 1 : i32
    %0 = arith.muli %arg0, %c1_i32 : i32
    %1 = arith.addi %0, %arg1 : i32
    %c0_i32 = arith.constant 0 : i32
    %2 = arith.minsi %1, %c0_i32 : i32
    %c0_i32_0 = arith.constant 0 : i32
    %c0_i32_1 = arith.constant 0 : i32
    return %2, %c0_i32_0 : i32, i32
  }
  func.func @transform_1(%arg0: i32, %arg1: i32) -> (i32, i32) {
    %c1_i32 = arith.constant 1 : i32
    %0 = arith.muli %arg0, %c1_i32 : i32
    %1 = arith.addi %0, %arg1 : i32
    %c0_i32 = arith.constant 0 : i32
    %2 = arith.minsi %1, %c0_i32 : i32
    %c0_i32_0 = arith.constant 0 : i32
    %c0_i32_1 = arith.constant 0 : i32
    return %2, %c0_i32_0 : i32, i32
  }
  func.func @transform_2(%arg0: i32, %arg1: i32) -> (i32, i32, i32) {
    %c0_i32 = arith.constant 0 : i32
    %c0_i32_0 = arith.constant 0 : i32
    %c0_i32_1 = arith.constant 0 : i32
    return %arg0, %c0_i32, %c0_i32_0 : i32, i32, i32
  }
}

</mosaic_0001>

<bundles_post_ra>
// kernel: tpu_custom_call.1
= control target key start
LH: loop header
LB: loop body
LE: loop exit
PB: predicated region body
PF: predicated region fallthrough
CT: control target
= control target key end

     0   :  { %7 = vsyncpa [#allocation4], 0  ;;  %s247_s0 = inlined_call_operand.hbm [shape: f32[16,128], index: 0, kind: input, shape index: {}]   ;;  %s248_s1 = inlined_call_operand.hbm [shape: f32[16,128], index: 1, kind: input, shape index: {}]   ;;  %s249_s2 = inlined_call_operand.hbm [shape: f32[1,8,128], index: 2, kind: output, shape index: {}]  }
   0x1   :  { %8 = vsyncpa [#allocation7], 0 }
   0x2   :  { %9 = vsyncpa [#allocation5], 0  ;;  %s191_s9 = smov [#allocation3]   ;;  %s119_s13 = scalar_lea.hbm %s247_s0, 256 }
   0x3   :  { %s21_s10 = sshll.u32 %s191_s9, 4  ;;  %p120_p0 = scmp.ne.s32.totalorder %s247_s0, %s119_s13  ;;  %s22_s10 = int_to_ptr.vmem [resolvable:$true] %s21_s10 }
   0x4   :  { %p123_p1 = scmp.lt.u32.totalorder %s119_s13, %s247_s0 }
   0x6   :  { %p125_p2 = pnand %p123_p1, %p120_p0 }
   0x8   :  { %128 = shalt.err (!%p125_p2)
}
   0x9   :  { %s129_s18 = scalar_lea.vmem %s22_s10, 256  ;;  %p134_p4 = scmp.lt.s32.totalorder %s22_s10, %s22_s10 }
   0xa   :  { %p130_p3 = scmp.ne.s32.totalorder %s22_s10, %s129_s18  ;;  %p135_p5 = scmp.lt.s32.totalorder %s129_s18, %s129_s18 }
   0xc   :  { %p136_p6 = por %p135_p5, %p134_p4 }
   0xe   :  { %p137_p7 = pnand %p136_p6, %p130_p3 }
  0x10   :  { %140 = shalt.err (!%p137_p7)
}
  0x11   :  { %s192_s19 = smov 128   ;;  %s193_s20 = smov 8  }
  0x12   :  { %27 = dma.hbm_to_vmem [thread:$0]  %s247_s0, 256, %s22_s10, [#allocation4], %s192_s19, %s192_s19, %s193_s20  }
  0x13   :  { %s194_s23 = smov [#allocation6]   ;;  %s141_s27 = scalar_lea.hbm %s248_s1, 256 }
  0x14   :  { %s39_s24 = sshll.u32 %s194_s23, 4  ;;  %p142_p8 = scmp.ne.s32.totalorder %s248_s1, %s141_s27  ;;  %s40_s24 = int_to_ptr.vmem [resolvable:$true] %s39_s24 }
  0x15   :  { %p145_p9 = scmp.lt.u32.totalorder %s141_s27, %s248_s1 }
  0x17   :  { %p147_p10 = pnand %p145_p9, %p142_p8 }
  0x19   :  { %150 = shalt.err (!%p147_p10)
}
  0x1a   :  { %s151_s4 = scalar_lea.vmem %s40_s24, 256  ;;  %p156_p12 = scmp.lt.s32.totalorder %s40_s24, %s40_s24 }
  0x1b   :  { %p152_p11 = scmp.ne.s32.totalorder %s40_s24, %s151_s4  ;;  %p157_p13 = scmp.lt.s32.totalorder %s151_s4, %s151_s4 }
  0x1d   :  { %p158_p0 = por %p157_p13, %p156_p12 }
  0x1f   :  { %p159_p1 = pnand %p158_p0, %p152_p11 }
  0x21   :  { %162 = shalt.err (!%p159_p1)
}
  0x22   :  { %45 = dma.hbm_to_vmem [thread:$0]  %s248_s1, 256, %s40_s24, [#allocation7], %s192_s19, %s192_s19, %s193_s20  }
  0x23   :  { %185 = dma.done.wait [#allocation4], 256  }
  0x24   :  { %186 = vsyncadd [#allocation4], 4294967040 }
  0x25   :  { %187 = dma.done.wait [#allocation7], 256  }
  0x26   :  { %188 = vsyncadd [#allocation7], 4294967040  ;;  %v65_v0 = vld [vmem:[#allocation3] sm:$0xff]  ;;  %v66_v1 = vld [vmem:[#allocation3 + $0x8] sm:$0xff]  ;;  %s195_s6 = smov [#allocation8]  }
  0x27   :  { %v67_v2 = vld [vmem:[#allocation6] sm:$0xff]  ;;  %v68_v3 = vld [vmem:[#allocation6 + $0x8] sm:$0xff]  ;;  %s100_s7 = sshll.u32 %s195_s6, 4  ;;  %s101_s7 = int_to_ptr.vmem [resolvable:$true] %s100_s7 }
  0x28   :  { %v69_v4 = vsub.f32 %v65_v0, %v67_v2  ;;  %v70_v5 = vsub.f32 %v66_v1, %v68_v3  ;;  %s163_s8 = scalar_lea.vmem %s101_s7, 128  ;;  %p168_p3 = scmp.lt.s32.totalorder %s101_s7, %s101_s7 }
  0x29   :  { %p164_p2 = scmp.ne.s32.totalorder %s101_s7, %s163_s8  ;;  %p169_p4 = scmp.lt.s32.totalorder %s163_s8, %s163_s8 }
  0x2a   :  { %v71_v6 = vand.u32 2147483647, %v69_v4  ;;  %v72_v7 = vand.u32 2147483647, %v70_v5 }
  0x2b   :  { %p170_p5 = por %p169_p4, %p168_p3 }
  0x2c   :  { %v86_v8 = vadd.f32 %v72_v7, %v71_v6 }
  0x2d   :  { %p171_p6 = pnand %p170_p5, %p164_p2 }
  0x2e   :  { %93 = vst [vmem:[#allocation8] sm:$0xff] %v86_v8 }
  0x2f   :  { %174 = shalt.err (!%p171_p6)
}
  0x30   :  { %s175_s10 = scalar_lea.hbm %s249_s2, 128 }
  0x31   :  { %p176_p7 = scmp.ne.s32.totalorder %s249_s2, %s175_s10  ;;  %p179_p8 = scmp.lt.u32.totalorder %s175_s10, %s249_s2 }
  0x33   :  { %p181_p9 = pnand %p179_p8, %p176_p7 }
  0x35   :  { %184 = shalt.err (!%p181_p9)
}
  0x36   :  { %103 = dma.vmem_to_hbm [thread:$0]  %s101_s7, 128, %s249_s2, [#allocation5]  }
  0x37   :  { %189 = dma.done.wait [#allocation5], 128  }
  0x38   :  { %190 = vsyncadd [#allocation5], 4294967168 }
  0x39   :  { %107 = vsyncpa [#allocation4], 1 }
  0x3a   :  { %108 = vsyncpa [#allocation7], 1 }
  0x3b   :  { %109 = vsyncpa [#allocation5], 1 }

</bundles_post_ra>
